<compile_context>
chip_gen: v7x
topology: tpu7x:2x2x1
jax: 0.10.0
libtpu: 0.0.40
codegen_flags: <defaults>
</compile_context>

<pallas_src>
import jax
import jax.numpy as jnp
from jax.experimental import pallas as pl
from jax.experimental.pallas import tpu as pltpu

LANE = 128  # lane-dense padding target for hidden / output widths


def ensemble_fused_kernel(x_ref, wf_ref, bf_ref, w1_ref, b1_ref,
                          w2_ref, b2_ref, out_ref):
    # Sub-model features. The llm stand-in (flatten+linear) and cnn stand-in
    # (avg-pool+linear) are both linear in x_flat, so the wrapper folds them
    # into a single weight matrix wf / bias bf:  feat == cat(llm_out, cnn_out).
    feat = (jnp.dot(x_ref[...], wf_ref[...], preferred_element_type=jnp.float32)
            + bf_ref[...])
    # fc1 + ReLU (hidden padded to a lane-dense width with zero columns).
    h = jnp.maximum(
        jnp.dot(feat, w1_ref[...], preferred_element_type=jnp.float32)
        + b1_ref[...], 0.0)
    # TODO(synk): nn.Dropout(0.2) is stochastic in train mode; eval-mode
    # (identity) is implemented here.
    out_ref[...] = (jnp.dot(h, w2_ref[...], preferred_element_type=jnp.float32)
                    + b2_ref[...]).astype(out_ref.dtype)


def _pad_cols(a, n):
    pad = n - a.shape[1]
    return a if pad == 0 else jnp.pad(a, ((0, 0), (0, pad)))


def ensemble_forward(x, wl, bl, wc, bc, w1, b1, w2, b2):
    """Full EnsembleModel forward (stand-in sub-models + cat + fc1 + ReLU +
    eval-mode dropout + fc2) in one Pallas call.

    x:  (B, C, H, W) f32
    wl: (C*H*W, D1), bl: (D1,)        -- "LLM" stand-in: flatten + linear
    wc: (C, D2),     bc: (D2,)        -- "CNN" stand-in: avg-pool + linear
    w1: (D1+D2, HID), b1: (HID,)      -- fc1 (stored (in, out); y = x @ W + b)
    w2: (HID, NB),    b2: (NB,)       -- fc2
    returns (B, NB) f32
    """
    B, C, H, W = x.shape
    d1, d2 = wl.shape[1], wc.shape[1]
    hidden = w1.shape[1]
    nb = w2.shape[1]

    # --- fold both stand-in sub-models into one feature matmul -------------
    # llm: x.reshape(B,-1) @ wl + bl
    # cnn: mean(x, (2,3)) @ wc + bc  ==  x.reshape(B,-1) @ wc_exp + bc, where
    #      wc_exp[c*H*W + k, :] = wc[c, :] / (H*W)   (exact linear fold)
    x_flat = x.reshape(B, C * H * W)
    wc_exp = jnp.repeat(wc / float(H * W), H * W, axis=0)        # (C*H*W, D2)
    w_feat = jnp.concatenate([wl, wc_exp], axis=1)               # (C*H*W, D1+D2)
    b_feat = jnp.concatenate([bl, bc]).reshape(1, d1 + d2)

    # --- pad hidden / nb to lane-dense widths (zero padding is exact) ------
    hp = max(LANE, ((hidden + LANE - 1) // LANE) * LANE)         # 33  -> 128
    npad = max(LANE, ((nb + LANE - 1) // LANE) * LANE)           # 5   -> 128
    w1_p = _pad_cols(w1, hp)                                     # (64, 128)
    b1_p = _pad_cols(b1.reshape(1, hidden), hp)                  # (1, 128)
    w2_p = _pad_cols(jnp.pad(w2, ((0, hp - hidden), (0, 0))), npad)  # (128, 128)
    b2_p = _pad_cols(b2.reshape(1, nb), npad)                    # (1, 128)

    vmem = pl.BlockSpec(memory_space=pltpu.MemorySpace.VMEM)
    out_padded = pl.pallas_call(
        ensemble_fused_kernel,
        out_shape=jax.ShapeDtypeStruct((B, npad), jnp.float32),
        in_specs=[vmem] * 7,
        out_specs=vmem,
    )(x_flat, w_feat, b_feat, w1_p, b1_p, w2_p, b2_p)
    return out_padded[:, :nb]


# ----------------------------------------------------------------------------
# Deterministic stand-ins for the injected sub-models (used only to build the
# pure-JAX reference; inside the kernel they are folded into w_feat/b_feat).
# ----------------------------------------------------------------------------
def llm_stand_in(x_nchw, wl, bl):
    B = x_nchw.shape[0]
    return x_nchw.reshape(B, -1) @ wl + bl


def cnn_stand_in(x_nchw, wc, bc):
    pooled = jnp.mean(x_nchw, axis=(2, 3))
    return pooled @ wc + bc


if __name__ == "__main__":
    # Small shapes consistent with the module.
    B, C, H, W = 2, 4, 16, 16
    llm_output_dim = 32
    cnn_output_dim = 32
    nb_classes = 5
    # NOTE: reference computes (llm+cnn)/2 + 1 (a float) for the hidden width;
    # an integer width is required, so integer division is used.
    hidden_dim = (llm_output_dim + cnn_output_dim) // 2 + 1  # = 33

    key = jax.random.PRNGKey(0)
    ks = jax.random.split(key, 9)

    x = jax.random.normal(ks[0], (B, C, H, W), dtype=jnp.float32)

    # Stand-in sub-model parameters (deterministic).
    wl = jax.random.normal(ks[1], (C * H * W, llm_output_dim), jnp.float32) * 0.02
    bl = jax.random.normal(ks[2], (llm_output_dim,), jnp.float32) * 0.02
    wc = jax.random.normal(ks[3], (C, cnn_output_dim), jnp.float32) * 0.1
    bc = jax.random.normal(ks[4], (cnn_output_dim,), jnp.float32) * 0.1

    # EnsembleModel head parameters (stored as (in, out); equivalent to
    # PyTorch's (out, in) weight with y = x @ W.T + b).
    w1 = jax.random.normal(
        ks[5], (llm_output_dim + cnn_output_dim, hidden_dim), jnp.float32) * 0.05
    b1 = jax.random.normal(ks[6], (hidden_dim,), jnp.float32) * 0.05
    w2 = jax.random.normal(ks[7], (hidden_dim, nb_classes), jnp.float32) * 0.05
    b2 = jax.random.normal(ks[8], (nb_classes,), jnp.float32) * 0.05

    # Fused Pallas forward pass.
    out = ensemble_forward(x, wl, bl, wc, bc, w1, b1, w2, b2)
    out = jax.block_until_ready(out)

    # Pure-JAX reference (unfused, unpadded) for sanity.
    llm_out = llm_stand_in(x, wl, bl)
    cnn_out = cnn_stand_in(x, wc, bc)
    feat = jnp.concatenate([llm_out, cnn_out], axis=1)
    ref = jnp.maximum(feat @ w1 + b1, 0.0) @ w2 + b2

    assert out.shape == (B, nb_classes)
    assert jnp.allclose(out, ref, atol=1e-4, rtol=1e-4)

    print("KERNEL_OK")
</pallas_src>

<mosaic_0001>
module attributes {stable_mosaic.version = 11 : i64} {
  func.func @ensemble_fused_kernel(%arg0: memref<2x1024xf32, #tpu.memory_space<vmem>>, %arg1: memref<1024x64xf32, #tpu.memory_space<vmem>>, %arg2: memref<1x64xf32, #tpu.memory_space<vmem>>, %arg3: memref<64x128xf32, #tpu.memory_space<vmem>>, %arg4: memref<1x128xf32, #tpu.memory_space<vmem>>, %arg5: memref<128x128xf32, #tpu.memory_space<vmem>>, %arg6: memref<1x128xf32, #tpu.memory_space<vmem>>, %arg7: memref<2x128xf32, #tpu.memory_space<vmem>>) attributes {dimension_semantics = [], scalar_prefetch = 0 : i64, scratch_operands = 0 : i64, tpu.core_type = #tpu.core_type<tc>} {
    %c0 = arith.constant 0 : index
    %c0_0 = arith.constant 0 : index
    %0 = vector.load %arg0[%c0, %c0_0] : memref<2x1024xf32, #tpu.memory_space<vmem>>, vector<2x1024xf32>
    %c0_1 = arith.constant 0 : index
    %c0_2 = arith.constant 0 : index
    %1 = vector.load %arg1[%c0_1, %c0_2] : memref<1024x64xf32, #tpu.memory_space<vmem>>, vector<1024x64xf32>
    %cst = arith.constant dense<0.000000e+00> : vector<2x64xf32>
    %2 = tpu.matmul %0, %1, %cst {dimension_numbers = #tpu.dot_dimension_numbers<[1], [0], [0], [1], [0, 0, 1, 1], [], []>} : vector<2x1024xf32>, vector<1024x64xf32>, vector<2x64xf32> -> vector<2x64xf32>
    %c0_3 = arith.constant 0 : index
    %c0_4 = arith.constant 0 : index
    %3 = vector.load %arg2[%c0_3, %c0_4] : memref<1x64xf32, #tpu.memory_space<vmem>>, vector<1x64xf32>
    %4 = vector.broadcast %3 : vector<1x64xf32> to vector<2x64xf32>
    %5 = arith.addf %2, %4 : vector<2x64xf32>
    %c0_5 = arith.constant 0 : index
    %c0_6 = arith.constant 0 : index
    %6 = vector.load %arg3[%c0_5, %c0_6] : memref<64x128xf32, #tpu.memory_space<vmem>>, vector<64x128xf32>
    %cst_7 = arith.constant dense<0.000000e+00> : vector<2x128xf32>
    %7 = tpu.matmul %5, %6, %cst_7 {dimension_numbers = #tpu.dot_dimension_numbers<[1], [0], [0], [1], [0, 0, 1, 1], [], []>} : vector<2x64xf32>, vector<64x128xf32>, vector<2x128xf32> -> vector<2x128xf32>
    %c0_8 = arith.constant 0 : index
    %c0_9 = arith.constant 0 : index
    %8 = vector.load %arg4[%c0_8, %c0_9] : memref<1x128xf32, #tpu.memory_space<vmem>>, vector<1x128xf32>
    %9 = vector.broadcast %8 : vector<1x128xf32> to vector<2x128xf32>
    %10 = arith.addf %7, %9 : vector<2x128xf32>
    %cst_10 = arith.constant 0.000000e+00 : f32
    %11 = vector.broadcast %cst_10 : f32 to vector<2x128xf32>
    %12 = arith.maximumf %10, %11 : vector<2x128xf32>
    %c0_11 = arith.constant 0 : index
    %c0_12 = arith.constant 0 : index
    %13 = vector.load %arg5[%c0_11, %c0_12] : memref<128x128xf32, #tpu.memory_space<vmem>>, vector<128x128xf32>
    %cst_13 = arith.constant dense<0.000000e+00> : vector<2x128xf32>
    %14 = tpu.matmul %12, %13, %cst_13 {dimension_numbers = #tpu.dot_dimension_numbers<[1], [0], [0], [1], [0, 0, 1, 1], [], []>} : vector<2x128xf32>, vector<128x128xf32>, vector<2x128xf32> -> vector<2x128xf32>
    %c0_14 = arith.constant 0 : index
    %c0_15 = arith.constant 0 : index
    %15 = vector.load %arg6[%c0_14, %c0_15] : memref<1x128xf32, #tpu.memory_space<vmem>>, vector<1x128xf32>
    %16 = vector.broadcast %15 : vector<1x128xf32> to vector<2x128xf32>
    %17 = arith.addf %14, %16 : vector<2x128xf32>
    %c0_16 = arith.constant 0 : index
    %c0_17 = arith.constant 0 : index
    %18 = vector.load %arg7[%c0_16, %c0_17] : memref<2x128xf32, #tpu.memory_space<vmem>>, vector<2x128xf32>
    tpu.vector_store %arg7[%c0_16, %c0_17], %17 {strides = array<i32>} : memref<2x128xf32, #tpu.memory_space<vmem>>, vector<2x128xf32>,
    return
  }
}

</mosaic_0001>

<bundles_post_ra>
// kernel: tpu_custom_call.1
= control target key start
LH: loop header
LB: loop body
LE: loop exit
PB: predicated region body
PF: predicated region fallthrough
CT: control target
= control target key end

     0   :  { %v1105_v47 = vmov 1983009808   ;;  %v170_v49 = vlaneseq  ;;  %s1644_s0 = inlined_call_operand.vmem [shape: f32[2,1024], index: 0, kind: input, shape index: {}]   ;;  %s1645_s1 = inlined_call_operand.vmem [shape: f32[1024,64], index: 1, kind: input, shape index: {}]   ;;  %s1646_s2 = inlined_call_operand.vmem [shape: f32[1,64], index: 2, kind: input, shape index: {}]   ;;  %s1647_s3 = inlined_call_operand.vmem [shape: f32[64,128], index: 3, kind: input, shape index: {}]   ;;  %s1648_s4 = inlined_call_operand.vmem [shape: f32[1,128], index: 4, kind: input, shape index: {}]   ;;  %s1649_s5 = inlined_call_operand.vmem [shape: f32[128,128], index: 5, kind: input, shape index: {}]   ;;  %s1650_s6 = inlined_call_operand.vmem [shape: f32[1,128], index: 6, kind: input, shape index: {}]   ;;  %s1651_s7 = inlined_call_operand.hbm [shape: f32[2,128], index: 7, kind: output, shape index: {}]  }
   0x1   :  { %v45_v0 = vld [vmem:[%s1645_s1 + $0x80] sm:$0xff]  ;;  %v46_v1 = vld [vmem:[%s1645_s1 + $0x88] sm:$0xff]  ;;  %v47_v11 = vld [vmem:[%s1645_s1 + $0x90] sm:$0xff]  ;;  %v168_v48 = vunpack.c.l.s4 %v1105_v47 }
   0x2   :  { %v29_v2 = vld [vmem:[%s1645_s1] sm:$0xff]  ;;  %v910_v3 = vpack.c.bf16 %v46_v1, %v45_v0  ;;  %v30_v4 = vld [vmem:[%s1645_s1 + $0x8] sm:$0xff]  ;;  %v48_v13 = vld [vmem:[%s1645_s1 + $0x98] sm:$0xff]  ;;  %v171_v0 = vshrl.u32 %v170_v49, 7 }
   0x3   :  { %v77_v5 = vld [vmem:[%s1645_s1 + $0x180] sm:$0xff]  ;;  %v78_v6 = vld [vmem:[%s1645_s1 + $0x188] sm:$0xff]  ;;  %v912_v7 = vpack.c.bf16 %v30_v4, %v29_v2  ;;  %v31_v14 = vld [vmem:[%s1645_s1 + $0x10] sm:$0xff]  ;;  %v914_v16 = vpack.c.bf16 %v48_v13, %v47_v11  ;;  %v169_v63 = vunpack.c.0.s8 %v168_v48 }
   0x4   :  { %v942_v8 = vpack.c.bf16 %v78_v6, %v77_v5  ;;  %v61_v9 = vld [vmem:[%s1645_s1 + $0x100] sm:$0xff]  ;;  %v62_v10 = vld [vmem:[%s1645_s1 + $0x108] sm:$0xff]  ;;  %911 = vmatprep.subr.bf16.mxu0 %v910_v3  ;;  %v32_v15 = vld [vmem:[%s1645_s1 + $0x18] sm:$0xff] }
   0x5   :  { %v944_v12 = vpack.c.bf16 %v62_v10, %v61_v9  ;;  %913 = vmatpush3.bf16.msra.mxu0 %v912_v7  ;;  %v916_v17 = vpack.c.bf16 %v32_v15, %v31_v14  ;;  %v79_v18 = vld [vmem:[%s1645_s1 + $0x190] sm:$0xff]  ;;  %v80_v19 = vld [vmem:[%s1645_s1 + $0x198] sm:$0xff]  ;;  %v49_v23 = vld [vmem:[%s1645_s1 + $0xa0] sm:$0xff]  ;;  %v1300_v13 = vsub.s32 %v169_v63, %v171_v0 }
   0x6   :  { %943 = vmatprep.subr.bf16.mxu1 %v942_v8  ;;  %v63_v20 = vld [vmem:[%s1645_s1 + $0x110] sm:$0xff]  ;;  %v946_v21 = vpack.c.bf16 %v80_v19, %v79_v18  ;;  %v64_v22 = vld [vmem:[%s1645_s1 + $0x118] sm:$0xff]  ;;  %v50_v24 = vld [vmem:[%s1645_s1 + $0xa8] sm:$0xff]  ;;  %915 = vmatprep.subr.bf16.mxu0 %v914_v16 }
   0x7   :  { %945 = vmatpush3.bf16.msra.mxu1 %v944_v12  ;;  %v948_v25 = vpack.c.bf16 %v64_v22, %v63_v20  ;;  %v918_v26 = vpack.c.bf16 %v50_v24, %v49_v23  ;;  %v33_v27 = vld [vmem:[%s1645_s1 + $0x20] sm:$0xff]  ;;  %v34_v28 = vld [vmem:[%s1645_s1 + $0x28] sm:$0xff]  ;;  %v51_v35 = vld [vmem:[%s1645_s1 + $0xb0] sm:$0xff] }
   0x8   :  { %v81_v29 = vld [vmem:[%s1645_s1 + $0x1a0] sm:$0xff]  ;;  %947 = vmatprep.subr.bf16.mxu1 %v946_v21  ;;  %v82_v30 = vld [vmem:[%s1645_s1 + $0x1a8] sm:$0xff]  ;;  %v920_v33 = vpack.c.bf16 %v34_v28, %v33_v27  ;;  %v52_v36 = vld [vmem:[%s1645_s1 + $0xb8] sm:$0xff] }
   0x9   :  { %v65_v31 = vld [vmem:[%s1645_s1 + $0x120] sm:$0xff]  ;;  %v66_v32 = vld [vmem:[%s1645_s1 + $0x128] sm:$0xff]  ;;  %917 = vmatpush3.bf16.msra.mxu0 %v916_v17  ;;  %v950_v34 = vpack.c.bf16 %v82_v30, %v81_v29  ;;  %v35_v37 = vld [vmem:[%s1645_s1 + $0x30] sm:$0xff]  ;;  %v922_v39 = vpack.c.bf16 %v52_v36, %v51_v35 }
   0xa   :  { %919 = vmatprep.subr.bf16.mxu0 %v918_v26  ;;  %v952_v38 = vpack.c.bf16 %v66_v32, %v65_v31  ;;  %v36_v40 = vld [vmem:[%s1645_s1 + $0x38] sm:$0xff]  ;;  %v83_v41 = vld [vmem:[%s1645_s1 + $0x1b0] sm:$0xff]  ;;  %v53_v46 = vld [vmem:[%s1645_s1 + $0xc0] sm:$0xff] }
   0xb   :  { %949 = vmatpush3.bf16.msra.mxu1 %v948_v25  ;;  %v84_v42 = vld [vmem:[%s1645_s1 + $0x1b8] sm:$0xff]  ;;  %v67_v44 = vld [vmem:[%s1645_s1 + $0x130] sm:$0xff]  ;;  %v54_v50 = vld [vmem:[%s1645_s1 + $0xc8] sm:$0xff]  ;;  %v924_v51 = vpack.c.bf16 %v36_v40, %v35_v37 }
   0xc   :  { %951 = vmatprep.subr.bf16.mxu1 %v950_v34  ;;  %v954_v43 = vpack.c.bf16 %v84_v42, %v83_v41  ;;  %v68_v45 = vld [vmem:[%s1645_s1 + $0x138] sm:$0xff]  ;;  %v85_v52 = vld [vmem:[%s1645_s1 + $0x1c0] sm:$0xff]  ;;  %v86_v53 = vld [vmem:[%s1645_s1 + $0x1c8] sm:$0xff]  ;;  %v926_v55 = vpack.c.bf16 %v54_v50, %v53_v46 }
   0xd   :  { %921 = vmatpush3.bf16.msra.mxu0 %v920_v33  ;;  %v956_v54 = vpack.c.bf16 %v68_v45, %v67_v44  ;;  %v37_v56 = vld [vmem:[%s1645_s1 + $0x40] sm:$0xff]  ;;  %v38_v57 = vld [vmem:[%s1645_s1 + $0x48] sm:$0xff]  ;;  %v958_v59 = vpack.c.bf16 %v86_v53, %v85_v52  ;;  %v55_v61 = vld [vmem:[%s1645_s1 + $0xd0] sm:$0xff] }
   0xe   :  { %923 = vmatprep.subr.bf16.mxu0 %v922_v39  ;;  %v69_v58 = vld [vmem:[%s1645_s1 + $0x140] sm:$0xff]  ;;  %v70_v60 = vld [vmem:[%s1645_s1 + $0x148] sm:$0xff]  ;;  %v56_v62 = vld [vmem:[%s1645_s1 + $0xd8] sm:$0xff]  ;;  %v928_v3 = vpack.c.bf16 %v38_v57, %v37_v56 }
   0xf   :  { %953 = vmatpush3.bf16.msra.mxu1 %v952_v38  ;;  %v87_v1 = vld [vmem:[%s1645_s1 + $0x1d0] sm:$0xff]  ;;  %v88_v2 = vld [vmem:[%s1645_s1 + $0x1d8] sm:$0xff]  ;;  %v960_v4 = vpack.c.bf16 %v70_v60, %v69_v58  ;;  %v930_v5 = vpack.c.bf16 %v56_v62, %v55_v61  ;;  %v57_v11 = vld [vmem:[%s1645_s1 + $0xe0] sm:$0xff] }
  0x10   :  { %955 = vmatprep.subr.bf16.mxu1 %v954_v43  ;;  %v39_v6 = vld [vmem:[%s1645_s1 + $0x50] sm:$0xff]  ;;  %v40_v7 = vld [vmem:[%s1645_s1 + $0x58] sm:$0xff]  ;;  %v962_v9 = vpack.c.bf16 %v88_v2, %v87_v1  ;;  %v58_v12 = vld [vmem:[%s1645_s1 + $0xe8] sm:$0xff] }
  0x11   :  { %925 = vmatpush3.bf16.msra.mxu0 %v924_v51  ;;  %v71_v8 = vld [vmem:[%s1645_s1 + $0x150] sm:$0xff]  ;;  %v72_v10 = vld [vmem:[%s1645_s1 + $0x158] sm:$0xff]  ;;  %v89_v14 = vld [vmem:[%s1645_s1 + $0x1e0] sm:$0xff]  ;;  %v932_v16 = vpack.c.bf16 %v40_v7, %v39_v6  ;;  %v934_v19 = vpack.c.bf16 %v58_v12, %v57_v11 }
  0x12   :  { %927 = vmatprep.subr.bf16.mxu0 %v926_v55  ;;  %v90_v15 = vld [vmem:[%s1645_s1 + $0x1e8] sm:$0xff]  ;;  %v41_v17 = vld [vmem:[%s1645_s1 + $0x60] sm:$0xff]  ;;  %v964_v18 = vpack.c.bf16 %v72_v10, %v71_v8  ;;  %v59_v25 = vld [vmem:[%s1645_s1 + $0xf0] sm:$0xff] }
  0x13   :  { %957 = vmatpush3.bf16.msra.mxu1 %v956_v54  ;;  %v42_v20 = vld [vmem:[%s1645_s1 + $0x68] sm:$0xff]  ;;  %v73_v21 = vld [vmem:[%s1645_s1 + $0x160] sm:$0xff]  ;;  %v966_v23 = vpack.c.bf16 %v90_v15, %v89_v14  ;;  %v60_v26 = vld [vmem:[%s1645_s1 + $0xf8] sm:$0xff] }
  0x14   :  { %959 = vmatprep.subr.bf16.mxu1 %v958_v59  ;;  %v27_v22 = vld [vmem:[%s1644_s0] sm:$0xff]  ;;  %v74_v24 = vld [vmem:[%s1645_s1 + $0x168] sm:$0xff]  ;;  %v91_v29 = vld [vmem:[%s1645_s1 + $0x1f0] sm:$0xff]  ;;  %v936_v31 = vpack.c.bf16 %v42_v20, %v41_v17  ;;  %v938_v35 = vpack.c.bf16 %v60_v26, %v59_v25 }
  0x15   :  { %929 = vmatpush3.bf16.msra.mxu0 %v928_v3  ;;  %v173_v27 = vrot.slane %v27_v22, %v1300_v13  ;;  %v166_v28 = vcombine.high %v27_v22, %v27_v22  ;;  %v92_v30 = vld [vmem:[%s1645_s1 + $0x1f8] sm:$0xff]  ;;  %v968_v34 = vpack.c.bf16 %v74_v24, %v73_v21  ;;  %v43_v36 = vld [vmem:[%s1645_s1 + $0x70] sm:$0xff]  ;;  %v109_v41 = vld [vmem:[%s1645_s1 + $0x280] sm:$0xff] }
  0x16   :  { %931 = vmatprep.subr.bf16.mxu0 %v930_v5  ;;  %v44_v37 = vld [vmem:[%s1645_s1 + $0x78] sm:$0xff]  ;;  %v75_v38 = vld [vmem:[%s1645_s1 + $0x170] sm:$0xff]  ;;  %v970_v39 = vpack.c.bf16 %v92_v30, %v91_v29  ;;  %v110_v42 = vld [vmem:[%s1645_s1 + $0x288] sm:$0xff] }
  0x17   :  { %961 = vmatpush3.bf16.msra.mxu1 %v960_v4  ;;  %v181_v32 = vcombine.high %v173_v27, %v173_v27  ;;  %v180_v33 = vrot.slane %v166_v28, %v1300_v13  ;;  %v76_v40 = vld [vmem:[%s1645_s1 + $0x178] sm:$0xff]  ;;  %v141_v44 = vld [vmem:[%s1645_s1 + $0x380] sm:$0xff]  ;;  %v142_v45 = vld [vmem:[%s1645_s1 + $0x388] sm:$0xff]  ;;  %v940_v46 = vpack.c.bf16 %v44_v37, %v43_v36  ;;  %v974_v48 = vpack.c.bf16 %v110_v42, %v109_v41 }
  0x18   :  { %963 = vmatprep.subr.bf16.mxu1 %v962_v9  ;;  %v972_v47 = vpack.c.bf16 %v76_v40, %v75_v38  ;;  %v93_v49 = vld [vmem:[%s1645_s1 + $0x200] sm:$0xff]  ;;  %v94_v50 = vld [vmem:[%s1645_s1 + $0x208] sm:$0xff]  ;;  %v1006_v52 = vpack.c.bf16 %v142_v45, %v141_v44  ;;  %v111_v54 = vld [vmem:[%s1645_s1 + $0x290] sm:$0xff] }
  0x19   :  { %933 = vmatpush3.bf16.msra.mxu0 %v932_v16  ;;  %272 = vmatprep.mubr.f32.mxu0 %v181_v32  ;;  %v182_v43 = vcombine.high %v180_v33, %v180_v33  ;;  %v125_v51 = vld [vmem:[%s1645_s1 + $0x300] sm:$0xff]  ;;  %v126_v53 = vld [vmem:[%s1645_s1 + $0x308] sm:$0xff]  ;;  %v112_v55 = vld [vmem:[%s1645_s1 + $0x298] sm:$0xff]  ;;  %v976_v58 = vpack.c.bf16 %v94_v50, %v93_v49 }
  0x1a   :  { %935 = vmatprep.subr.bf16.mxu0 %v934_v19  ;;  %v143_v56 = vld [vmem:[%s1645_s1 + $0x390] sm:$0xff]  ;;  %v144_v57 = vld [vmem:[%s1645_s1 + $0x398] sm:$0xff]  ;;  %v1008_v59 = vpack.c.bf16 %v126_v53, %v125_v51  ;;  %v978_v60 = vpack.c.bf16 %v112_v55, %v111_v54  ;;  %v113_v2 = vld [vmem:[%s1645_s1 + $0x2a0] sm:$0xff] }
  0x1b   :  { %965 = vmatpush3.bf16.msra.mxu1 %v964_v18  ;;  %342 = vmatprep.mubr.f32.mxu1 %v182_v43  ;;  %v95_v61 = vld [vmem:[%s1645_s1 + $0x210] sm:$0xff]  ;;  %v96_v62 = vld [vmem:[%s1645_s1 + $0x218] sm:$0xff]  ;;  %v1010_v0 = vpack.c.bf16 %v144_v57, %v143_v56  ;;  %v114_v3 = vld [vmem:[%s1645_s1 + $0x2a8] sm:$0xff] }
  0x1c   :  { %967 = vmatprep.subr.bf16.mxu1 %v966_v23  ;;  %v127_v63 = vld [vmem:[%s1645_s1 + $0x310] sm:$0xff]  ;;  %v128_v1 = vld [vmem:[%s1645_s1 + $0x318] sm:$0xff]  ;;  %v145_v4 = vld [vmem:[%s1645_s1 + $0x3a0] sm:$0xff]  ;;  %v980_v6 = vpack.c.bf16 %v96_v62, %v95_v61  ;;  %v982_v8 = vpack.c.bf16 %v114_v3, %v113_v2 }
  0x1d   :  { %937 = vmatpush3.bf16.msra.mxu0 %v936_v31  ;;  %v146_v5 = vld [vmem:[%s1645_s1 + $0x3a8] sm:$0xff]  ;;  %v1012_v7 = vpack.c.bf16 %v128_v1, %v127_v63  ;;  %v97_v9 = vld [vmem:[%s1645_s1 + $0x220] sm:$0xff]  ;;  %v115_v15 = vld [vmem:[%s1645_s1 + $0x2b0] sm:$0xff] }
  0x1e   :  { %939 = vmatprep.subr.bf16.mxu0 %v938_v35  ;;  %v98_v10 = vld [vmem:[%s1645_s1 + $0x228] sm:$0xff]  ;;  %v129_v11 = vld [vmem:[%s1645_s1 + $0x320] sm:$0xff]  ;;  %v1014_v12 = vpack.c.bf16 %v146_v5, %v145_v4  ;;  %v116_v16 = vld [vmem:[%s1645_s1 + $0x2b8] sm:$0xff] }
  0x1f   :  { %969 = vmatpush3.bf16.msra.mxu1 %v968_v34  ;;  %v130_v14 = vld [vmem:[%s1645_s1 + $0x328] sm:$0xff]  ;;  %v147_v17 = vld [vmem:[%s1645_s1 + $0x3b0] sm:$0xff]  ;;  %v148_v18 = vld [vmem:[%s1645_s1 + $0x3b8] sm:$0xff]  ;;  %v984_v19 = vpack.c.bf16 %v98_v10, %v97_v9  ;;  %v986_v22 = vpack.c.bf16 %v116_v16, %v115_v15 }
  0x20   :  { %971 = vmatprep.subr.bf16.mxu1 %v970_v39  ;;  %v99_v20 = vld [vmem:[%s1645_s1 + $0x230] sm:$0xff]  ;;  %v1016_v21 = vpack.c.bf16 %v130_v14, %v129_v11  ;;  %v100_v23 = vld [vmem:[%s1645_s1 + $0x238] sm:$0xff]  ;;  %v1018_v26 = vpack.c.bf16 %v148_v18, %v147_v17  ;;  %v118_v28 = vld [vmem:[%s1645_s1 + $0x2c8] sm:$0xff] }
  0x21   :  { %941 = vmatpush3.bf16.msra.mxu0 %v940_v46  ;;  %v131_v24 = vld [vmem:[%s1645_s1 + $0x330] sm:$0xff]  ;;  %v132_v25 = vld [vmem:[%s1645_s1 + $0x338] sm:$0xff]  ;;  %v149_v29 = vld [vmem:[%s1645_s1 + $0x3c0] sm:$0xff] }
  0x22   :  { %975 = vmatprep.subr.bf16.mxu0 %v974_v48  ;;  %v150_v30 = vld [vmem:[%s1645_s1 + $0x3c8] sm:$0xff] }
  0x23   :  { %973 = vmatpush3.bf16.msra.mxu1 %v972_v47  ;;  %v28_v31 = vld [vmem:[%s1644_s0 + $0x8] sm:$0xff] }
  0x24   :  { %1007 = vmatprep.subr.bf16.mxu1 %v1006_v52  ;;  %273 = vmatmul.mubr.f32.vlgmr.msra.gmra.mrb[0].mxu0 %v173_v27  ;;  %v117_v27 = vld [vmem:[%s1645_s1 + $0x2c0] sm:$0xff] }
  0x25   :  { %977 = vmatpush3.bf16.msra.mxu0 %v976_v58 }
  0x26   :  { %343 = vmatmul.mubr.f32.vlgmr.msra.gmra.mrb[0].mxu1 %v180_v33  ;;  %979 = vmatprep.subr.bf16.mxu0 %v978_v60 }
  0x27   :  { %1009 = vmatpush3.bf16.msra.mxu1 %v1008_v59 }
  0x28   :  { %1011 = vmatprep.subr.bf16.mxu1 %v1010_v0 }
  0x29   :  { %981 = vmatpush3.bf16.msra.mxu0 %v980_v6 }
  0x2a   :  { %983 = vmatprep.subr.bf16.mxu0 %v982_v8 }
  0x2b   :  { %1013 = vmatpush3.bf16.msra.mxu1 %v1012_v7 }
  0x2c   :  { %1015 = vmatprep.subr.bf16.mxu1 %v1014_v12 }
  0x2d   :  { %12 = vsyncpa [#allocation3], 0  ;;  %985 = vmatpush3.bf16.msra.mxu0 %v984_v19  ;;  %v988_v32 = vpack.c.bf16 %v100_v23, %v99_v20  ;;  %v1461_v33 = vrot.slane %v28_v31, %v1300_v13  ;;  %v183_v34 = vcombine.high %v28_v31, %v28_v31  ;;  %v1020_v35 = vpack.c.bf16 %v132_v25, %v131_v24  ;;  %v101_v37 = vld [vmem:[%s1645_s1 + $0x240] sm:$0xff]  ;;  %v102_v38 = vld [vmem:[%s1645_s1 + $0x248] sm:$0xff]  ;;  %s1109_s29 = smov [#allocation2]  }
  0x2e   :  { %987 = vmatprep.subr.bf16.mxu0 %v986_v22  ;;  %v990_v36 = vpack.c.bf16 %v118_v28, %v117_v27  ;;  %v133_v39 = vld [vmem:[%s1645_s1 + $0x340] sm:$0xff]  ;;  %v1022_v40 = vpack.c.bf16 %v150_v30, %v149_v29  ;;  %v134_v41 = vld [vmem:[%s1645_s1 + $0x348] sm:$0xff]  ;;  %v119_v42 = vld [vmem:[%s1645_s1 + $0x2d0] sm:$0xff]  ;;  %v992_v48 = vpack.c.bf16 %v102_v38, %v101_v37  ;;  %v1106_v22 = vmov 0.0|0.0   ;;  %s678_s30 = sshll.u32 %s1109_s29, 4  ;;  %s679_s30 = int_to_ptr.vmem [resolvable:$true] %s678_s30 }
  0x2f   :  { %1017 = vmatpush3.bf16.msra.mxu1 %v1016_v21  ;;  %v120_v43 = vld [vmem:[%s1645_s1 + $0x2d8] sm:$0xff]  ;;  %v198_v44 = vcombine.high %v1461_v33, %v1461_v33  ;;  %v197_v45 = vrot.slane %v183_v34, %v1300_v13  ;;  %v151_v46 = vld [vmem:[%s1645_s1 + $0x3d0] sm:$0xff]  ;;  %v1024_v50 = vpack.c.bf16 %v134_v41, %v133_v39  ;;  %v121_v56 = vld [vmem:[%s1645_s1 + $0x2e0] sm:$0xff]  ;;  %vm1107_vm0 = vmmov 0   ;;  %p1086_p1 = scmp.lt.s32.totalorder %s679_s30, %s679_s30 }
  0x30   :  { %1019 = vmatprep.subr.bf16.mxu1 %v1018_v26  ;;  %v152_v47 = vld [vmem:[%s1645_s1 + $0x3d8] sm:$0xff]  ;;  %v994_v51 = vpack.c.bf16 %v120_v43, %v119_v42  ;;  %v103_v13 = vld [vmem:[%s1645_s1 + $0x250] sm:$0xff]  ;;  %v122_v57 = vld [vmem:[%s1645_s1 + $0x2e8] sm:$0xff]  ;;  %vm503_vm1 = vcmask 523264  }
  0x31   :  { %989 = vmatpush3.bf16.msra.mxu0 %v988_v32  ;;  %412 = vmatprep.mubr.f32.mxu0 %v198_v44  ;;  %v199_v49 = vcombine.high %v197_v45, %v197_v45  ;;  %v104_v52 = vld [vmem:[%s1645_s1 + $0x258] sm:$0xff]  ;;  %v135_v53 = vld [vmem:[%s1645_s1 + $0x350] sm:$0xff]  ;;  %v1026_v54 = vpack.c.bf16 %v152_v47, %v151_v46  ;;  %v153_v58 = vld [vmem:[%s1645_s1 + $0x3e0] sm:$0xff]  ;;  %v998_v62 = vpack.c.bf16 %v122_v57, %v121_v56  ;;  %v1108_v32 = vmov 0.0  }
  0x32   :  { %991 = vmatprep.subr.bf16.mxu0 %v990_v36  ;;  %v136_v55 = vld [vmem:[%s1645_s1 + $0x358] sm:$0xff]  ;;  %v154_v59 = vld [vmem:[%s1645_s1 + $0x3e8] sm:$0xff]  ;;  %v996_v60 = vpack.c.bf16 %v104_v52, %v103_v13  ;;  %v105_v63 = vld [vmem:[%s1645_s1 + $0x260] sm:$0xff] }
  0x33   :  { %1021 = vmatpush3.bf16.msra.mxu1 %v1020_v35  ;;  %482 = vmatprep.mubr.f32.mxu1 %v199_v49  ;;  %v1028_v61 = vpack.c.bf16 %v136_v55, %v135_v53  ;;  %v106_v0 = vld [vmem:[%s1645_s1 + $0x268] sm:$0xff]  ;;  %v137_v1 = vld [vmem:[%s1645_s1 + $0x360] sm:$0xff]  ;;  %v1030_v2 = vpack.c.bf16 %v154_v59, %v153_v58  ;;  %v123_v4 = vld [vmem:[%s1645_s1 + $0x2f0] sm:$0xff] }
  0x34   :  { %1023 = vmatprep.subr.bf16.mxu1 %v1022_v40  ;;  %v138_v3 = vld [vmem:[%s1645_s1 + $0x368] sm:$0xff]  ;;  %v124_v5 = vld [vmem:[%s1645_s1 + $0x2f8] sm:$0xff]  ;;  %v155_v6 = vld [vmem:[%s1645_s1 + $0x3f0] sm:$0xff]  ;;  %v1000_v8 = vpack.c.bf16 %v106_v0, %v105_v63 }
  0x35   :  { %993 = vmatpush3.bf16.msra.mxu0 %v992_v48  ;;  %v156_v7 = vld [vmem:[%s1645_s1 + $0x3f8] sm:$0xff]  ;;  %v1032_v9 = vpack.c.bf16 %v138_v3, %v137_v1  ;;  %v1002_v10 = vpack.c.bf16 %v124_v5, %v123_v4  ;;  %v107_v11 = vld [vmem:[%s1645_s1 + $0x270] sm:$0xff]  ;;  %v488_v19 = vld [vmem:[%s1647_s3] sm:$0xff] }
  0x36   :  { %995 = vmatprep.subr.bf16.mxu0 %v994_v51  ;;  %v108_v12 = vld [vmem:[%s1645_s1 + $0x278] sm:$0xff]  ;;  %v1034_v14 = vpack.c.bf16 %v156_v7, %v155_v6  ;;  %v139_v15 = vld [vmem:[%s1645_s1 + $0x370] sm:$0xff]  ;;  %v489_v20 = vld [vmem:[%s1647_s3 + $0x8] sm:$0xff] }
  0x37   :  { %1025 = vmatpush3.bf16.msra.mxu1 %v1024_v50  ;;  %v140_v16 = vld [vmem:[%s1645_s1 + $0x378] sm:$0xff]  ;;  %v1004_v17 = vpack.c.bf16 %v108_v12, %v107_v11  ;;  %v490_v21 = vld [vmem:[%s1647_s3 + $0x10] sm:$0xff]  ;;  %v1039_v23 = vpack.c.bf16 %v489_v20, %v488_v19  ;;  %v492_v26 = vld [vmem:[%s1647_s3 + $0x20] sm:$0xff] }
  0x38   :  { %1027 = vmatprep.subr.bf16.mxu1 %v1026_v54  ;;  %v1036_v18 = vpack.c.bf16 %v140_v16, %v139_v15  ;;  %v491_v24 = vld [vmem:[%s1647_s3 + $0x18] sm:$0xff]  ;;  %v493_v27 = vld [vmem:[%s1647_s3 + $0x28] sm:$0xff]  ;;  %v494_v29 = vld [vmem:[%s1647_s3 + $0x30] sm:$0xff] }
  0x39   :  { %997 = vmatpush3.bf16.msra.mxu0 %v996_v60  ;;  %v1042_v25 = vpack.c.bf16 %v491_v24, %v490_v21  ;;  %v1045_v28 = vpack.c.bf16 %v493_v27, %v492_v26  ;;  %v495_v30 = vld [vmem:[%s1647_s3 + $0x38] sm:$0xff]  ;;  %v579_v34 = vld [vmem:[%s1649_s5 + $0x8] sm:$0xff]  ;;  %v580_v35 = vld [vmem:[%s1649_s5 + $0x10] sm:$0xff] }
  0x3a   :  { %999 = vmatprep.subr.bf16.mxu0 %v998_v62  ;;  %v1048_v31 = vpack.c.bf16 %v495_v30, %v494_v29  ;;  %v581_v37 = vld [vmem:[%s1649_s5 + $0x18] sm:$0xff]  ;;  %v582_v39 = vld [vmem:[%s1649_s5 + $0x20] sm:$0xff]  ;;  %v583_v40 = vld [vmem:[%s1649_s5 + $0x28] sm:$0xff] }
  0x3b   :  { %1029 = vmatpush3.bf16.msra.mxu1 %v1028_v61  ;;  %v1054_v38 = vpack.c.bf16 %v581_v37, %v580_v35  ;;  %v1057_v41 = vpack.c.bf16 %v583_v40, %v582_v39  ;;  %v584_v42 = vld [vmem:[%s1649_s5 + $0x30] sm:$0xff]  ;;  %v585_v43 = vld [vmem:[%s1649_s5 + $0x38] sm:$0xff]  ;;  %v587_v46 = vld [vmem:[%s1649_s5 + $0x48] sm:$0xff] }
  0x3c   :  { %1031 = vmatprep.subr.bf16.mxu1 %v1030_v2  ;;  %v1060_v44 = vpack.c.bf16 %v585_v43, %v584_v42  ;;  %v588_v48 = vld [vmem:[%s1649_s5 + $0x50] sm:$0xff]  ;;  %v589_v49 = vld [vmem:[%s1649_s5 + $0x58] sm:$0xff]  ;;  %v590_v51 = vld [vmem:[%s1649_s5 + $0x60] sm:$0xff] }
  0x3d   :  { %1001 = vmatpush3.bf16.msra.mxu0 %v1000_v8  ;;  %v1066_v50 = vpack.c.bf16 %v589_v49, %v588_v48  ;;  %v591_v13 = vld [vmem:[%s1649_s5 + $0x68] sm:$0xff]  ;;  %v686_v54 = vld [vmem:[%s1646_s2] ss:$0 sm:$0xff]  ;;  %v592_v6 = vld [vmem:[%s1649_s5 + $0x70] sm:$0xff] }
  0x3e   :  { %1003 = vmatprep.subr.bf16.mxu0 %v1002_v10  ;;  %v1069_v52 = vpack.c.bf16 %v591_v13, %v590_v51  ;;  %v593_v7 = vld [vmem:[%s1649_s5 + $0x78] sm:$0xff]  ;;  %v689_v15 = vld [vmem:[%s1650_s6] ss:$0 sm:$0xff] }
  0x3f   :  { %1033 = vmatpush3.bf16.msra.mxu1 %v1032_v9  ;;  %v1072_v8 = vpack.c.bf16 %v593_v7, %v592_v6  ;;  %v687_v9 = vld [vmem:[%s1648_s4] ss:$0 sm:$0xff] }
  0x40   :  { %1035 = vmatprep.subr.bf16.mxu1 %v1034_v14 }
  0x41   :  { %1005 = vmatpush3.bf16.msra.mxu0 %v1004_v17 }
  0x42   :  { %1038 = vmatprep.subr.bf16.mxu0 %v1106_v22 }
  0x43   :  { %1037 = vmatpush3.bf16.msra.mxu1 %v1036_v18 }
  0x44   :  { %413 = vmatmul.mubr.f32.vlgmr.msra.gmra.mrb[2].mxu0 %v1461_v33  ;;  %1050 = vmatprep.subr.bf16.mxu1 %v1106_v22  ;;  %v578_v33 = vld [vmem:[%s1649_s5] sm:$0xff] }
  0x45   :  { %1040 = vmatpush3.bf16.msra.mxu0 %v1039_v23  ;;  %872 = vmatprep.mubr.msk.f32.mxu0 %vm1107_vm0, %v1108_v32  ;;  %v1051_v36 = vpack.c.bf16 %v579_v34, %v578_v33 }
  0x46   :  { %483 = vmatmul.mubr.f32.vlgmr.msra.gmra.mrb[2].mxu1 %v197_v45  ;;  %1041 = vmatprep.subr.bf16.mxu0 %v1106_v22  ;;  %v586_v45 = vld [vmem:[%s1649_s5 + $0x40] sm:$0xff]  ;;  %s1081_s5 = scalar_lea.vmem %s679_s30, 32 }
  0x47   :  { %907 = vmatprep.mubr.msk.f32.mxu1 %vm1107_vm0, %v1108_v32  ;;  %1052 = vmatpush3.bf16.msra.mxu1 %v1051_v36  ;;  %v1063_v47 = vpack.c.bf16 %v587_v46, %v586_v45  ;;  %p1082_p0 = scmp.ne.s32.totalorder %s679_s30, %s1081_s5  ;;  %p1087_p2 = scmp.lt.s32.totalorder %s1081_s5, %s1081_s5 }
  0x48   :  { %1053 = vmatprep.subr.bf16.mxu1 %v1106_v22 }
  0x49   :  { %1043 = vmatpush3.bf16.msra.mxu0 %v1042_v25  ;;  %p1088_p3 = por %p1087_p2, %p1086_p1 }
  0x4a   :  { %1044 = vmatprep.subr.bf16.mxu0 %v1106_v22 }
  0x4b   :  { %1055 = vmatpush3.bf16.msra.mxu1 %v1054_v38  ;;  %p1089_p4 = pnand %p1088_p3, %p1082_p0 }
  0x4c   :  { %1056 = vmatprep.subr.bf16.mxu1 %v1106_v22 }
  0x4d   :  { %1046 = vmatpush3.bf16.msra.mxu0 %v1045_v28 }
  0x4e   :  { %1047 = vmatprep.subr.bf16.mxu0 %v1106_v22 }
  0x4f   :  { %1058 = vmatpush3.bf16.msra.mxu1 %v1057_v41 }
  0x50   :  { %1059 = vmatprep.subr.bf16.mxu1 %v1106_v22 }
  0x51   :  { %1049 = vmatpush3.bf16.msra.mxu0 %v1048_v31 }
  0x53   :  { %1061 = vmatpush3.bf16.msra.mxu1 %v1060_v44 }
  0x54   :  { %1062 = vmatprep.subr.bf16.mxu1 %v1106_v22 }
  0x57   :  { %1064 = vmatpush3.bf16.msra.mxu1 %v1063_v47 }
  0x58   :  { %1065 = vmatprep.subr.bf16.mxu1 %v1106_v22 }
  0x5b   :  { %1067 = vmatpush3.bf16.msra.mxu1 %v1066_v50 }
  0x5c   :  { %1068 = vmatprep.subr.bf16.mxu1 %v1106_v22 }
  0x5f   :  { %1070 = vmatpush3.bf16.msra.mxu1 %v1069_v52 }
  0x60   :  { %1071 = vmatprep.subr.bf16.mxu1 %v1106_v22 }
  0x63   :  { %1073 = vmatpush3.bf16.msra.mxu1 %v1072_v8 }
  0xf7   :  { %v722_v53 = vpop.f32.mrb[0].mxu0 }
  0xf8   :  { %v723_v55 = vpop.f32.mrb[1].mxu0 }
  0xf9   :  { %v757_v56 = vpop.f32.mrb[0].mxu1  ;;  %v724_v57 = vadd.f32 %v723_v55, %v722_v53 }
  0xfa   :  { %v758_v58 = vpop.f32.mrb[1].mxu1 }
  0xfb   :  { %v759_v59 = vadd.f32 %v758_v58, %v757_v56  ;;  %v275_v60 = vadd.f32 %v724_v57, %v686_v54 }
  0xfd   :  { %v345_v61 = vadd.f32 %v759_v59, %v275_v60 }
 0x117   :  { %v792_v62 = vpop.f32.mrb[2].mxu0 }
 0x118   :  { %v793_v63 = vpop.f32.mrb[3].mxu0 }
 0x119   :  { %v827_v0 = vpop.f32.mrb[2].mxu1  ;;  %v794_v1 = vadd.f32 %v793_v63, %v792_v62 }
 0x11a   :  { %v828_v2 = vpop.f32.mrb[3].mxu1 }
 0x11b   :  { %v829_v3 = vadd.f32 %v828_v2, %v827_v0  ;;  %v415_v4 = vadd.f32 %v794_v1, %v345_v61 }
 0x11d   :  { %v485_v5 = vadd.f32 %v829_v3, %v415_v4 }
 0x11f   :  { %873 = vmatmul.mubr.msk.f32.vlgmr.msra.gmra.mrb[4].mxu0 %vm503_vm1, %v485_v5 }
 0x1f2   :  { %v573_v10 = vpop.f32.mrb[4].mxu0 }
 0x1f3   :  { %v574_v11 = vadd.f32 %v687_v9, %v573_v10  ;;  %v874_v12 = vpop.f32.mrb[5].mxu0 }
 0x1f5   :  { %v577_v14 = vmax.f32 %v574_v11, 0.0 }
 0x1f7   :  { %908 = vmatmul.mubr.f32.vlgmr.msra.gmra.mrb[4].mxu1 %v577_v14 }
 0x2ca   :  { %v667_v16 = vpop.f32.mrb[4].mxu1 }
 0x2cb   :  { %v668_v17 = vadd.f32 %v689_v15, %v667_v16  ;;  %v909_v18 = vpop.f32.mrb[5].mxu1 }
 0x2cd   :  { %671 = vst [vmem:[#allocation2] sm:$0x3] %v668_v17 }
 0x2ce   :  { %1092 = shalt.err (!%p1089_p4)
}
 0x2cf   :  { %s1093_s1 = scalar_lea.hbm %s1651_s7, 32 }
 0x2d0   :  { %p1094_p5 = scmp.ne.s32.totalorder %s1651_s7, %s1093_s1  ;;  %p1097_p6 = scmp.lt.u32.totalorder %s1093_s1, %s1651_s7 }
 0x2d2   :  { %p1099_p7 = pnand %p1097_p6, %p1094_p5 }
 0x2d4   :  { %1102 = shalt.err (!%p1099_p7)
}
 0x2d5   :  { %681 = dma.vmem_to_hbm [thread:$0]  %s679_s30, 32, %s1651_s7, [#allocation3]  }
 0x2d6   :  { %1103 = dma.done.wait [#allocation3], 32  }
 0x2d7   :  { %1104 = vsyncadd [#allocation3], 4294967264 }
 0x2d8   :  { %685 = vsyncpa [#allocation3], 1 }

</bundles_post_ra>
